<compile_context>
chip_gen: v6e
topology: v6e:2x2x1
jax: 0.10.0
libtpu: 0.0.40
codegen_flags: <defaults>
</compile_context>

<pallas_src>
import jax
import jax.numpy as jnp
from jax.experimental import pallas as pl
from jax.experimental.pallas import tpu as pltpu


def _round_up(x, m):
    return ((x + m - 1) // m) * m


def _ngram_kernel(x_ref,    # (TB, Kp)   param dtype — gathered embeddings
                  w1_ref,   # (Kp, H)    param dtype
                  b1_ref,   # (1, H)     f32
                  w2_ref,   # (H, TV)    param dtype — one vocab tile
                  b2_ref,   # (1, TV)    f32 (pad cols = -1e30)
                  out_ref,  # (TB, TV)   f32 — lane-dense output block
                  h_sc,     # (TB, H)    f32 scratch — hidden activations
                  m_sc,     # (TB, 1)    f32 scratch — running max, then lse
                  l_sc):    # (TB, 1)    f32 scratch — running sum(exp)
    p = pl.program_id(1)          # 0: stats pass, 1: write pass
    j = pl.program_id(2)          # vocab tile index
    nv = pl.num_programs(2)

    @pl.when(jnp.logical_and(p == 0, j == 0))
    def _():
        # linear1 + ReLU once per batch tile; reused across both passes.
        h = jnp.dot(x_ref[...], w1_ref[...], preferred_element_type=jnp.float32)
        h_sc[...] = jnp.maximum(h + b1_ref[...], 0.0)
        m_sc[...] = jnp.full_like(m_sc, -jnp.inf)
        l_sc[...] = jnp.zeros_like(l_sc)

    # linear2 for this vocab tile (recomputed on the write pass).  Pad vocab
    # columns carry a -1e30 bias: they never win the max and exp() underflows
    # to exactly 0, so the log-softmax over real columns is unchanged.
    logits = jnp.dot(h_sc[...].astype(w2_ref.dtype), w2_ref[...],
                     preferred_element_type=jnp.float32) + b2_ref[...]

    @pl.when(p == 0)
    def _():
        m_new = jnp.maximum(m_sc[...], jnp.max(logits, axis=1, keepdims=True))
        l_sc[...] = (l_sc[...] * jnp.exp(m_sc[...] - m_new)
                     + jnp.sum(jnp.exp(logits - m_new), axis=1, keepdims=True))
        m_sc[...] = m_new

    @pl.when(jnp.logical_and(p == 0, j == nv - 1))
    def _():
        m_sc[...] = m_sc[...] + jnp.log(l_sc[...])    # m_sc now holds row lse

    @pl.when(p == 1)
    def _():
        out_ref[...] = logits - m_sc[...]             # unmasked 128-lane store


def prepare_params(emb, w1_t, b1, w2_t, b2, *, tile_v=2048,
                   param_dtype=jnp.float32):
    """One-time layout plumbing, hoisted out of the per-call path.

    emb: (V, E); w1_t: (C*E, 128); b1: (128,); w2_t: (128, V); b2: (V,).
    param_dtype=bfloat16 recommended on v6e/v7x; float32 preserves exact
    module semantics.
    """
    V, E = emb.shape
    K, H = w1_t.shape
    assert w2_t.shape == (H, V)

    k_pad = _round_up(K, 128)                       # K dim padded -> full MXU pass
    tile_v = max(128, (int(tile_v) // 128) * 128)   # lane-dense vocab tiles
    tile_v = min(tile_v, _round_up(V, 128))
    v_pad = _round_up(V, tile_v)

    params = dict(
        emb=emb.astype(param_dtype),
        w1=jnp.zeros((k_pad, H), param_dtype).at[:K, :].set(
            w1_t.astype(param_dtype)),
        b1=b1.reshape(1, H).astype(jnp.float32),
        w2=jnp.zeros((H, v_pad), param_dtype).at[:, :V].set(
            w2_t.astype(param_dtype)),
        b2=jnp.full((1, v_pad), -1e30, jnp.float32).at[:, :V].set(
            b2.reshape(-1).astype(jnp.float32)),
    )
    meta = dict(V=V, E=E, K=K, k_pad=k_pad, H=H, tile_v=tile_v, v_pad=v_pad)
    return params, meta


def ngram_forward_batched(inputs, params, meta, *, tile_b=128):
    """(B, C) int32 token ids -> (B, V) float32 log-probs."""
    B, C = inputs.shape
    V, E, K, k_pad, H = meta["V"], meta["E"], meta["K"], meta["k_pad"], meta["H"]
    tile_v, v_pad = meta["tile_v"], meta["v_pad"]
    assert K == C * E, "context_size * embedding_dim mismatch with linear1"

    tile_b = max(8, min(_round_up(tile_b, 8), _round_up(B, 8)))
    b_pad = _round_up(B, tile_b)
    nb, nv = b_pad // tile_b, v_pad // tile_v

    # Embedding lookup as a vectorized XLA gather in the wrapper (review item);
    # the kernel sees one dense, zero-padded (b_pad, k_pad) activation.
    # XLA clamps out-of-range ids (nn.Embedding would raise).
    # TODO(synk): surface an explicit out-of-range-id check for parity with torch.
    x = params["emb"][inputs.astype(jnp.int32)].reshape(B, K)
    x = jnp.zeros((b_pad, k_pad), params["emb"].dtype).at[:B, :K].set(x)

    out = pl.pallas_call(
        _ngram_kernel,
        out_shape=jax.ShapeDtypeStruct((b_pad, v_pad), jnp.float32),
        grid_spec=pltpu.PrefetchScalarGridSpec(
            num_scalar_prefetch=0,
            # (batch tiles, {stats pass, write pass}, vocab tiles)
            grid=(nb, 2, nv),
            in_specs=[
                pl.BlockSpec((tile_b, k_pad), lambda i, p, j: (i, 0)),  # x
                pl.BlockSpec((k_pad, H),      lambda i, p, j: (0, 0)),  # W1
                pl.BlockSpec((1, H),          lambda i, p, j: (0, 0)),  # b1
                pl.BlockSpec((H, tile_v),     lambda i, p, j: (0, j)),  # W2 tile
                pl.BlockSpec((1, tile_v),     lambda i, p, j: (0, j)),  # b2 tile
            ],
            # During the stats pass the output stays parked on block (i, 0) and
            # is only flushed after the write pass has filled it.
            out_specs=pl.BlockSpec((tile_b, tile_v), lambda i, p, j: (i, j * p)),
            scratch_shapes=[
                pltpu.VMEM((tile_b, H), jnp.float32),   # hidden activations
                pltpu.VMEM((tile_b, 1), jnp.float32),   # running max -> lse
                pltpu.VMEM((tile_b, 1), jnp.float32),   # running sum(exp)
            ],
        ),
        compiler_params=pltpu.CompilerParams(
            # batch tiles across TensorCores on v7x; passes/vocab are sequential.
            dimension_semantics=("parallel", "arbitrary", "arbitrary")),
    )(x, params["w1"], params["b1"], params["w2"], params["b2"])

    return out[:B, :V]


def ngram_forward(inputs, params, meta, **kwargs):
    """Original module semantics: (C,) token ids -> (1, V) log-probs."""
    return ngram_forward_batched(inputs[None, :], params, meta, **kwargs)


def _reference(inputs_bc, emb, w1_t, b1, w2_t, b2):
    x = emb[inputs_bc].reshape(inputs_bc.shape[0], -1)
    h = jnp.maximum(jnp.dot(x, w1_t, precision="highest") + b1.reshape(1, -1), 0.0)
    logits = jnp.dot(h, w2_t, precision="highest") + b2.reshape(1, -1)
    return jax.nn.log_softmax(logits, axis=1)


if __name__ == "__main__":
    hidden = 128  # fixed by the module (linear1 -> 128)

    def make_model(key, vocab_size, embedding_dim, context_size):
        k_emb, k_w1, k_b1, k_w2, k_b2 = jax.random.split(key, 5)
        fan1 = context_size * embedding_dim
        emb = jax.random.normal(k_emb, (vocab_size, embedding_dim), jnp.float32)
        w1_t = jax.random.uniform(k_w1, (fan1, hidden), jnp.float32,
                                  minval=-1.0 / jnp.sqrt(fan1),
                                  maxval=1.0 / jnp.sqrt(fan1))
        b1 = jax.random.uniform(k_b1, (hidden,), jnp.float32,
                                minval=-1.0 / jnp.sqrt(fan1),
                                maxval=1.0 / jnp.sqrt(fan1))
        w2_t = jax.random.uniform(k_w2, (hidden, vocab_size), jnp.float32,
                                  minval=-1.0 / jnp.sqrt(hidden),
                                  maxval=1.0 / jnp.sqrt(hidden))
        b2 = jax.random.uniform(k_b2, (vocab_size,), jnp.float32,
                                minval=-1.0 / jnp.sqrt(hidden),
                                maxval=1.0 / jnp.sqrt(hidden))
        return emb, w1_t, b1, w2_t, b2

    key = jax.random.PRNGKey(0)
    k_model, k_idx, k_model2, k_idx2 = jax.random.split(key, 4)

    # ---- small model: single vocab tile (nv = 1) ----
    vocab_size, embedding_dim, context_size, batch = 32, 16, 4, 16
    emb, w1_t, b1, w2_t, b2 = make_model(k_model, vocab_size, embedding_dim,
                                         context_size)
    params, meta = prepare_params(emb, w1_t, b1, w2_t, b2)

    # original module semantics: one (C,) context window -> (1, V)
    window = jax.random.randint(k_idx, (context_size,), 0, vocab_size, jnp.int32)
    out1 = jax.block_until_ready(ngram_forward(window, params, meta))
    ref1 = _reference(window[None, :], emb, w1_t, b1, w2_t, b2)
    assert out1.shape == (1, vocab_size)
    assert jnp.allclose(out1, ref1, atol=1e-5, rtol=1e-5), "single-window mismatch"

    # batched path (the main perf lever)
    windows = jax.random.randint(k_idx, (batch, context_size), 0, vocab_size,
                                 jnp.int32)
    outb = jax.block_until_ready(ngram_forward_batched(windows, params, meta))
    refb = _reference(windows, emb, w1_t, b1, w2_t, b2)
    assert outb.shape == (batch, vocab_size)
    assert jnp.allclose(outb, refb, atol=1e-5, rtol=1e-5), "batched f32 mismatch"

    # bf16 params (v6e/v7x recommended) with f32 accumulation — looser tolerance
    params_bf, meta_bf = prepare_params(emb, w1_t, b1, w2_t, b2,
                                        param_dtype=jnp.bfloat16)
    outbf = jax.block_until_ready(ngram_forward_batched(windows, params_bf, meta_bf))
    assert jnp.allclose(outbf, refb, atol=1e-1), "batched bf16 mismatch"

    # ---- larger vocab with forced small tiles: exercises the online
    #      log-softmax across multiple vocab tiles and multiple batch tiles ----
    vocab_size2, batch2 = 300, 40
    emb2, w1_t2, b1_2, w2_t2, b2_2 = make_model(k_model2, vocab_size2,
                                                embedding_dim, context_size)
    params2, meta2 = prepare_params(emb2, w1_t2, b1_2, w2_t2, b2_2, tile_v=128)
    windows2 = jax.random.randint(k_idx2, (batch2, context_size), 0, vocab_size2,
                                  jnp.int32)
    out2 = jax.block_until_ready(
        ngram_forward_batched(windows2, params2, meta2, tile_b=16))
    ref2 = _reference(windows2, emb2, w1_t2, b1_2, w2_t2, b2_2)
    assert out2.shape == (batch2, vocab_size2)
    assert jnp.allclose(out2, ref2, atol=1e-5, rtol=1e-5), "tiled vocab mismatch"

    print("KERNEL_OK")
</pallas_src>

<mosaic_0001>
module attributes {stable_mosaic.version = 11 : i64} {
  func.func @_ngram_kernel(%arg0: i32, %arg1: i32, %arg2: i32, %arg3: memref<8x128xf32, #tpu.memory_space<vmem>>, %arg4: memref<128x128xf32, #tpu.memory_space<vmem>>, %arg5: memref<1x128xf32, #tpu.memory_space<vmem>>, %arg6: memref<128x128xf32, #tpu.memory_space<vmem>>, %arg7: memref<1x128xf32, #tpu.memory_space<vmem>>, %arg8: memref<8x128xf32, #tpu.memory_space<vmem>>, %arg9: memref<8x128xf32, #tpu.memory_space<vmem>>, %arg10: memref<8x1xf32, #tpu.memory_space<vmem>>, %arg11: memref<8x1xf32, #tpu.memory_space<vmem>>) attributes {dimension_semantics = [#tpu.dimension_semantics<parallel>, #tpu.dimension_semantics<arbitrary>, #tpu.dimension_semantics<arbitrary>], iteration_bounds = array<i64: 1, 2, 1>, scalar_prefetch = 0 : i64, scratch_operands = 3 : i64, tpu.core_type = #tpu.core_type<tc>, window_params = [{transform_indices = @transform_0, window_bounds = array<i64: 8, 128>}, {pipeline_mode = #tpu.pipeline_mode<synchronous>, transform_indices = @transform_1, window_bounds = array<i64: 128, 128>}, {pipeline_mode = #tpu.pipeline_mode<synchronous>, transform_indices = @transform_2, window_bounds = array<i64: 1, 128>}, {transform_indices = @transform_3, window_bounds = array<i64: 128, 128>}, {transform_indices = @transform_4, window_bounds = array<i64: 1, 128>}, {transform_indices = @transform_5, window_bounds = array<i64: 8, 128>}]} {
    %c0_i32 = arith.constant 0 : i32
    %0 = arith.cmpi eq, %arg1, %c0_i32 : i32
    %c0_i32_0 = arith.constant 0 : i32
    %1 = arith.cmpi eq, %arg2, %c0_i32_0 : i32
    %2 = arith.andi %0, %1 : i1
    %3 = arith.extui %2 : i1 to i32
    %c0_i32_1 = arith.constant 0 : i32
    %4 = arith.cmpi ne, %3, %c0_i32_1 : i32
    scf.if %4 {
      %c0_13 = arith.constant 0 : index
      %c0_14 = arith.constant 0 : index
      %22 = vector.load %arg3[%c0_13, %c0_14] : memref<8x128xf32, #tpu.memory_space<vmem>>, vector<8x128xf32>
      %c0_15 = arith.constant 0 : index
      %c0_16 = arith.constant 0 : index
      %23 = vector.load %arg4[%c0_15, %c0_16] : memref<128x128xf32, #tpu.memory_space<vmem>>, vector<128x128xf32>
      %cst_17 = arith.constant dense<0.000000e+00> : vector<8x128xf32>
      %24 = tpu.matmul %22, %23, %cst_17 {dimension_numbers = #tpu.dot_dimension_numbers<[1], [0], [0], [1], [0, 0, 1, 1], [], []>} : vector<8x128xf32>, vector<128x128xf32>, vector<8x128xf32> -> vector<8x128xf32>
      %c0_18 = arith.constant 0 : index
      %c0_19 = arith.constant 0 : index
      %25 = vector.load %arg5[%c0_18, %c0_19] : memref<1x128xf32, #tpu.memory_space<vmem>>, vector<1x128xf32>
      %26 = vector.broadcast %25 : vector<1x128xf32> to vector<8x128xf32>
      %27 = arith.addf %24, %26 : vector<8x128xf32>
      %cst_20 = arith.constant 0.000000e+00 : f32
      %28 = vector.broadcast %cst_20 : f32 to vector<8x128xf32>
      %29 = arith.maximumf %27, %28 : vector<8x128xf32>
      %c0_21 = arith.constant 0 : index
      %c0_22 = arith.constant 0 : index
      %30 = vector.load %arg9[%c0_21, %c0_22] : memref<8x128xf32, #tpu.memory_space<vmem>>, vector<8x128xf32>
      tpu.vector_store %arg9[%c0_21, %c0_22], %29 {strides = array<i32>} : memref<8x128xf32, #tpu.memory_space<vmem>>, vector<8x128xf32>,
      %cst_23 = arith.constant 0xFF800000 : f32
      %31 = vector.broadcast %cst_23 : f32 to vector<8x1xf32>
      %c0_24 = arith.constant 0 : index
      %c0_25 = arith.constant 0 : index
      %32 = vector.load %arg10[%c0_24, %c0_25] : memref<8x1xf32, #tpu.memory_space<vmem>>, vector<8x1xf32>
      tpu.vector_store %arg10[%c0_24, %c0_25], %31 {strides = array<i32>} : memref<8x1xf32, #tpu.memory_space<vmem>>, vector<8x1xf32>,
      %cst_26 = arith.constant 0.000000e+00 : f32
      %33 = vector.broadcast %cst_26 : f32 to vector<8x1xf32>
      %c0_27 = arith.constant 0 : index
      %c0_28 = arith.constant 0 : index
      %34 = vector.load %arg11[%c0_27, %c0_28] : memref<8x1xf32, #tpu.memory_space<vmem>>, vector<8x1xf32>
      tpu.vector_store %arg11[%c0_27, %c0_28], %33 {strides = array<i32>} : memref<8x1xf32, #tpu.memory_space<vmem>>, vector<8x1xf32>,
    } else {
    }
    %c0 = arith.constant 0 : index
    %c0_2 = arith.constant 0 : index
    %5 = vector.load %arg9[%c0, %c0_2] : memref<8x128xf32, #tpu.memory_space<vmem>>, vector<8x128xf32>
    %c0_3 = arith.constant 0 : index
    %c0_4 = arith.constant 0 : index
    %6 = vector.load %arg6[%c0_3, %c0_4] : memref<128x128xf32, #tpu.memory_space<vmem>>, vector<128x128xf32>
    %cst = arith.constant dense<0.000000e+00> : vector<8x128xf32>
    %7 = tpu.matmul %5, %6, %cst {dimension_numbers = #tpu.dot_dimension_numbers<[1], [0], [0], [1], [0, 0, 1, 1], [], []>} : vector<8x128xf32>, vector<128x128xf32>, vector<8x128xf32> -> vector<8x128xf32>
    %c0_5 = arith.constant 0 : index
    %c0_6 = arith.constant 0 : index
    %8 = vector.load %arg7[%c0_5, %c0_6] : memref<1x128xf32, #tpu.memory_space<vmem>>, vector<1x128xf32>
    %9 = vector.broadcast %8 : vector<1x128xf32> to vector<8x128xf32>
    %10 = arith.addf %7, %9 : vector<8x128xf32>
    %c0_i32_7 = arith.constant 0 : i32
    %11 = arith.cmpi eq, %arg1, %c0_i32_7 : i32
    %12 = arith.extui %11 : i1 to i32
    %c0_i32_8 = arith.constant 0 : i32
    %13 = arith.cmpi ne, %12, %c0_i32_8 : i32
    scf.if %13 {
      %c0_13 = arith.constant 0 : index
      %c0_14 = arith.constant 0 : index
      %22 = vector.load %arg10[%c0_13, %c0_14] : memref<8x1xf32, #tpu.memory_space<vmem>>, vector<8x1xf32>
      %cst_15 = arith.constant dense<0xFF800000> : vector<8xf32>
      %23 = vector.multi_reduction <maximumf>, %10, %cst_15 [1] : vector<8x128xf32> to vector<8xf32>
      %24 = vector.shape_cast %23 : vector<8xf32> to vector<8x1xf32>
      %25 = arith.maximumf %22, %24 : vector<8x1xf32>
      %c0_16 = arith.constant 0 : index
      %c0_17 = arith.constant 0 : index
      %26 = vector.load %arg11[%c0_16, %c0_17] : memref<8x1xf32, #tpu.memory_space<vmem>>, vector<8x1xf32>
      %c0_18 = arith.constant 0 : index
      %c0_19 = arith.constant 0 : index
      %27 = vector.load %arg10[%c0_18, %c0_19] : memref<8x1xf32, #tpu.memory_space<vmem>>, vector<8x1xf32>
      %28 = arith.subf %27, %25 : vector<8x1xf32>
      %29 = math.exp %28 : vector<8x1xf32>
      %30 = arith.mulf %26, %29 : vector<8x1xf32>
      %31 = vector.broadcast %25 : vector<8x1xf32> to vector<8x128xf32>
      %32 = arith.subf %10, %31 : vector<8x128xf32>
      %33 = math.exp %32 : vector<8x128xf32>
      %cst_20 = arith.constant dense<0.000000e+00> : vector<8xf32>
      %34 = vector.multi_reduction <add>, %33, %cst_20 [1] : vector<8x128xf32> to vector<8xf32>
      %35 = vector.shape_cast %34 : vector<8xf32> to vector<8x1xf32>
      %36 = arith.addf %30, %35 : vector<8x1xf32>
      %c0_21 = arith.constant 0 : index
      %c0_22 = arith.constant 0 : index
      %37 = vector.load %arg11[%c0_21, %c0_22] : memref<8x1xf32, #tpu.memory_space<vmem>>, vector<8x1xf32>
      tpu.vector_store %arg11[%c0_21, %c0_22], %36 {strides = array<i32>} : memref<8x1xf32, #tpu.memory_space<vmem>>, vector<8x1xf32>,
      %c0_23 = arith.constant 0 : index
      %c0_24 = arith.constant 0 : index
      %38 = vector.load %arg10[%c0_23, %c0_24] : memref<8x1xf32, #tpu.memory_space<vmem>>, vector<8x1xf32>
      tpu.vector_store %arg10[%c0_23, %c0_24], %25 {strides = array<i32>} : memref<8x1xf32, #tpu.memory_space<vmem>>, vector<8x1xf32>,
    } else {
    }
    %c0_i32_9 = arith.constant 0 : i32
    %14 = arith.cmpi eq, %arg1, %c0_i32_9 : i32
    %c0_i32_10 = arith.constant 0 : i32
    %15 = arith.cmpi eq, %arg2, %c0_i32_10 : i32
    %16 = arith.andi %14, %15 : i1
    %17 = arith.extui %16 : i1 to i32
    %c0_i32_11 = arith.constant 0 : i32
    %18 = arith.cmpi ne, %17, %c0_i32_11 : i32
    scf.if %18 {
      %c0_13 = arith.constant 0 : index
      %c0_14 = arith.constant 0 : index
      %22 = vector.load %arg10[%c0_13, %c0_14] : memref<8x1xf32, #tpu.memory_space<vmem>>, vector<8x1xf32>
      %c0_15 = arith.constant 0 : index
      %c0_16 = arith.constant 0 : index
      %23 = vector.load %arg11[%c0_15, %c0_16] : memref<8x1xf32, #tpu.memory_space<vmem>>, vector<8x1xf32>
      %24 = math.log %23 : vector<8x1xf32>
      %25 = arith.addf %22, %24 : vector<8x1xf32>
      %c0_17 = arith.constant 0 : index
      %c0_18 = arith.constant 0 : index
      %26 = vector.load %arg10[%c0_17, %c0_18] : memref<8x1xf32, #tpu.memory_space<vmem>>, vector<8x1xf32>
      tpu.vector_store %arg10[%c0_17, %c0_18], %25 {strides = array<i32>} : memref<8x1xf32, #tpu.memory_space<vmem>>, vector<8x1xf32>,
    } else {
    }
    %c1_i32 = arith.constant 1 : i32
    %19 = arith.cmpi eq, %arg1, %c1_i32 : i32
    %20 = arith.extui %19 : i1 to i32
    %c0_i32_12 = arith.constant 0 : i32
    %21 = arith.cmpi ne, %20, %c0_i32_12 : i32
    scf.if %21 {
      %c0_13 = arith.constant 0 : index
      %c0_14 = arith.constant 0 : index
      %22 = vector.load %arg10[%c0_13, %c0_14] : memref<8x1xf32, #tpu.memory_space<vmem>>, vector<8x1xf32>
      %23 = vector.broadcast %22 : vector<8x1xf32> to vector<8x128xf32>
      %24 = arith.subf %10, %23 : vector<8x128xf32>
      %c0_15 = arith.constant 0 : index
      %c0_16 = arith.constant 0 : index
      %25 = vector.load %arg8[%c0_15, %c0_16] : memref<8x128xf32, #tpu.memory_space<vmem>>, vector<8x128xf32>
      tpu.vector_store %arg8[%c0_15, %c0_16], %24 {strides = array<i32>} : memref<8x128xf32, #tpu.memory_space<vmem>>, vector<8x128xf32>,
    } else {
    }
    return
  }
  func.func @transform_0(%arg0: i32, %arg1: i32, %arg2: i32) -> (i32, i32) {
    %c0_i32 = arith.constant 0 : i32
    %c0_i32_0 = arith.constant 0 : i32
    return %arg0, %c0_i32 : i32, i32
  }
  func.func @transform_1(%arg0: i32, %arg1: i32, %arg2: i32) -> (i32, i32) {
    %c0_i32 = arith.constant 0 : i32
    %c0_i32_0 = arith.constant 0 : i32
    %c0_i32_1 = arith.constant 0 : i32
    return %c0_i32, %c0_i32_0 : i32, i32
  }
  func.func @transform_2(%arg0: i32, %arg1: i32, %arg2: i32) -> (i32, i32) {
    %c0_i32 = arith.constant 0 : i32
    %c0_i32_0 = arith.constant 0 : i32
    %c0_i32_1 = arith.constant 0 : i32
    return %c0_i32, %c0_i32_0 : i32, i32
  }
  func.func @transform_3(%arg0: i32, %arg1: i32, %arg2: i32) -> (i32, i32) {
    %c0_i32 = arith.constant 0 : i32
    %c0_i32_0 = arith.constant 0 : i32
    return %c0_i32, %arg2 : i32, i32
  }
  func.func @transform_4(%arg0: i32, %arg1: i32, %arg2: i32) -> (i32, i32) {
    %c0_i32 = arith.constant 0 : i32
    %c0_i32_0 = arith.constant 0 : i32
    return %c0_i32, %arg2 : i32, i32
  }
  func.func @transform_5(%arg0: i32, %arg1: i32, %arg2: i32) -> (i32, i32) {
    %0 = arith.muli %arg2, %arg1 : i32
    %c0_i32 = arith.constant 0 : i32
    return %arg0, %0 : i32, i32
  }
}

</mosaic_0001>

<bundles_post_ra>
// kernel: tpu_custom_call.1
= control target key start
LH: loop header
LB: loop body
LE: loop exit
PB: predicated region body
PF: predicated region fallthrough
CT: control target
= control target key end

     0   :  { %10 = vsyncpa [#allocation6], 0  ;;  %s1183_s0 = inlined_call_operand.hbm [shape: f32[8,128], index: 0, kind: input, shape index: {}]   ;;  %s1184_s1 = inlined_call_operand.hbm [shape: f32[128,128], index: 1, kind: input, shape index: {}]   ;;  %s1185_s2 = inlined_call_operand.vmem [shape: f32[1,128], index: 2, kind: input, shape index: {}]   ;;  %s1186_s3 = inlined_call_operand.hbm [shape: f32[128,128], index: 3, kind: input, shape index: {}]   ;;  %s1187_s4 = inlined_call_operand.vmem [shape: f32[1,128], index: 4, kind: input, shape index: {}]   ;;  %s1188_s5 = inlined_call_operand.hbm [shape: f32[8,128], index: 5, kind: output, shape index: {}]  }
   0x1   :  { %11 = vsyncpa [#allocation9], 0 }
   0x2   :  { %12 = vsyncpa [#allocation7], 0 }
   0x3   :  { %14 = vsyncpa [#allocation7 + $0x1], 0  ;;  %s1055_s18 = smov 0   ;;  %s1057_s19 = smov 0  }
   0x4   :  { %s1059_s20 = smov 0  }
   0x5 LB: > { %s1012_s21 = smov [#allocation8]   ;;  %s665_s23 = sadd.s32 4294967295, %s1010_s20   ;;  %s1010_s20 = sphi %s1059_s20, %s20_s20   ;;  %s1006_s19 = sphi %s1057_s19, %s1198_s19   ;;  %s1002_s18 = sphi %s1055_s18, %s1197_s18  }
   0x6   : > { %s219_s22 = sshll.u32 %s1012_s21, 4  ;;  %s666_s24 = sadd.s32 4294967294, %s1010_s20   ;;  %s220_s22 = int_to_ptr.vmem [resolvable:$true] %s219_s22 }
   0x7   : > { %p667_p0 = scmp.ge.s32.totalorder %s1010_s20, 1  ;;  %p194_p1 = scmp.lt.s32.totalorder %s1010_s20, 3 }
   0x8   : > { %p1076_p2 = scmp.eq.s32.totalorder %s665_s23, 0  ;;  %s35_s28 = sadd.s32 1, %s1006_s19 }
   0x9   : > { %p1080_p3 = pnand %p667_p0, %p194_p1  ;;  %p1093_p6 = scmp.ge.s32.totalorder %s35_s28, 2 }
   0xa   : > { %s1191_s25 = scalar_select %p1076_p2, 1, 0 }
   0xb   : > { %p806_p4 = pneg %p1080_p3  ;;  %s885_s30 = scalar_lea.vmem %s220_s22, 2048 }
   0xc   : > { %p886_p8 = scmp.ne.s32.totalorder %s220_s22, %s885_s30  ;;  %p893_p11 = scmp.lt.s32.totalorder %s220_s22, %s220_s22 }
   0xd   : > { %p1088_p5 = pnand %p1076_p2, %p806_p4  ;;  %p894_p12 = scmp.lt.s32.totalorder %s885_s30, %s885_s30 }
   0xf   : > { %p876_p7 = pneg %p1088_p5  ;;  %p895_p13 = por %p894_p12, %p893_p11 }
  0x11   : > { %p888_p9 = pnand %p886_p8, %p876_p7 }
  0x13   : > { %p889_p10 = pneg %p888_p9 }
  0x15   : > { %p896_p0 = pnand %p895_p13, %p889_p10 }
  0x17   : > { %899 = shalt.err (!%p896_p0)
}
  0x18   : > { %s1013_s6 = smov 128   ;;  %s1014_s7 = smov 8  }
  0x19   : > { %812 = dma.hbm_to_vmem [thread:$0]  (!%p1088_p5), %s1184_s1, 2048, %s220_s22, [#allocation9], %s1013_s6, %s1013_s6, %s1014_s7  }
  0x1a   : > { %s1200_s28 = smov (%p1093_p6, %s35_s28), 0  ;;  %s1015_s10 = smov [#allocation5]  }
  0x1b   : > { %s209_s11 = sshll.u32 %s1015_s10, 4  ;;  %s1016_s12 = smov [#allocation10]   ;;  %s210_s11 = int_to_ptr.vmem [resolvable:$true] %s209_s11 }
  0x1c   : > { %s237_s13 = sshll.u32 %s1016_s12, 4  ;;  %s911_s14 = scalar_lea.vmem %s210_s11, 128  ;;  %s238_s13 = int_to_ptr.vmem [resolvable:$true] %s237_s13 }
  0x1d   : > { %p912_p1 = scmp.ne.s32.totalorder %s210_s11, %s911_s14  ;;  %p919_p9 = scmp.lt.s32.totalorder %s210_s11, %s210_s11 }
  0x1e   : > { %p920_p10 = scmp.lt.s32.totalorder %s911_s14, %s911_s14 }
  0x1f   : > { %p914_p4 = pnand %p912_p1, %p876_p7 }
  0x20   : > { %p921_p11 = por %p920_p10, %p919_p9 }
  0x21   : > { %p915_p8 = pneg %p914_p4 }
  0x23   : > { %p922_p12 = pnand %p921_p11, %p915_p8 }
  0x25   : > { %925 = shalt.err (!%p922_p12)
}
  0x26   : > { %809 = dma.hbm_to_vmem [thread:$0]  (!%p1088_p5), %s1183_s0, 128, %s210_s11, [#allocation6]  }
  0x27   : > { %s937_s17 = scalar_lea.vmem %s238_s13, 2048  ;;  %p945_p1 = scmp.lt.s32.totalorder %s238_s13, %s238_s13 }
  0x28   : > { %p938_p6 = scmp.ne.s32.totalorder %s238_s13, %s937_s17  ;;  %p946_p4 = scmp.lt.s32.totalorder %s937_s17, %s937_s17 }
  0x2a   : > { %p940_p13 = pnand %p938_p6, %p876_p7  ;;  %p947_p2 = por %p946_p4, %p945_p1 }
  0x2c   : > { %p941_p0 = pneg %p940_p13 }
  0x2e   : > { %p948_p9 = pnand %p947_p2, %p941_p0 }
  0x30   : > { %951 = shalt.err (!%p948_p9)
}
  0x31   : > { %815 = dma.hbm_to_vmem [thread:$0]  (!%p1088_p5), %s1186_s3, 2048, %s238_s13, [#allocation9], %s1013_s6, %s1013_s6, %s1014_s7  }
  0x32   : > { %259 = sbr.rel (%p1080_p3) target bundleno = 1116 (0x45c), region = 40  ;;  %p1195_p7 = scmp.ne.s32.totalorder (!%p1080_p3), %s1191_s25, 0 }
  0x37   : > { %989 = dma.done.wait (%p1195_p7), [#allocation6], 128  }
  0x38   : > { %991 = vsyncadd (%p1195_p7), [#allocation6], 4294967168 }
  0x39   : > { %993 = dma.done.wait (%p1195_p7), [#allocation9], 4096  }
  0x3a   : > { %995 = vsyncadd (%p1195_p7), [#allocation9], 4294963200  ;;  %p297_p2 = scmp.eq.s32.totalorder %s1002_s18, 0 }
  0x3b   : > { %vm399_vm0 = vcmask (%p297_p2), 7168   ;;  %v319_v0 = vld [vmem:[#allocation8 + $0x78] sm:$0xff] (%p297_p2)  ;;  %v1017_v1 = vmov (%p297_p2), 0.0   ;;  %v1018_v2 = vmov (%p297_p2), -inf   ;;  %v318_v3 = vld [vmem:[#allocation8 + $0x70] sm:$0xff] (%p297_p2)  ;;  %vm1019_vm1 = vmmov (%p297_p2), 0  }
  0x3c   : > { %302 = sbr.rel (!%p297_p2) target bundleno = 290 (0x122), region = 56  ;;  %720 = vmatprep.subr.mxu0 (%p297_p2), %v1017_v1  ;;  %400 = vst.msk [vmem:[#allocation3] sm:$0xff] (%p297_p2), %vm399_vm0, %v1018_v2  ;;  %401 = vst.msk [vmem:[#allocation4] sm:$0xff] (%p297_p2), %vm399_vm0, %v1017_v1  ;;  %752 = vmatprep.mubr.msk.f32.mxu0 (%p297_p2), %vm1019_vm1, %v1017_v1  ;;  %v317_v4 = vld [vmem:[#allocation8 + $0x68] sm:$0xff] (%p297_p2)  ;;  %v316_v5 = vld [vmem:[#allocation8 + $0x60] sm:$0xff] (%p297_p2) }
  0x3d   : > { %721 = vmatpush3.msra.mxu0 (%p297_p2), %v319_v0  ;;  %v315_v6 = vld [vmem:[#allocation8 + $0x58] sm:$0xff] (%p297_p2)  ;;  %v314_v7 = vld [vmem:[#allocation8 + $0x50] sm:$0xff] (%p297_p2)  ;;  %v313_v8 = vld [vmem:[#allocation8 + $0x48] sm:$0xff] (%p297_p2) }
  0x3e   : > { %722 = vmatprep.subr.mxu0 (%p297_p2), %v1017_v1  ;;  %v312_v9 = vld [vmem:[#allocation8 + $0x40] sm:$0xff] (%p297_p2)  ;;  %v311_v10 = vld [vmem:[#allocation8 + $0x38] sm:$0xff] (%p297_p2)  ;;  %v310_v11 = vld [vmem:[#allocation8 + $0x30] sm:$0xff] (%p297_p2) }
  0x3f   : > { %723 = vmatpush3.msra.mxu0 (%p297_p2), %v318_v3  ;;  %v309_v12 = vld [vmem:[#allocation8 + $0x28] sm:$0xff] (%p297_p2)  ;;  %v308_v13 = vld [vmem:[#allocation8 + $0x20] sm:$0xff] (%p297_p2)  ;;  %v307_v14 = vld [vmem:[#allocation8 + $0x18] sm:$0xff] (%p297_p2) }
  0x40   : > { %724 = vmatprep.subr.mxu0 (%p297_p2), %v1017_v1  ;;  %v306_v15 = vld [vmem:[#allocation8 + $0x10] sm:$0xff] (%p297_p2)  ;;  %v305_v16 = vld [vmem:[#allocation8 + $0x8] sm:$0xff] (%p297_p2)  ;;  %v304_v17 = vld [vmem:[#allocation8] sm:$0xff] (%p297_p2) }
  0x41   : > { %725 = vmatpush3.msra.mxu0 %v317_v4  ;;  %v303_v18 = vld [vmem:[#allocation5] sm:$0xff]  ;;  %v677_v19 = vld [vmem:[%s1185_s2] ss:$0 sm:$0xff] }
  0x42   : > { %726 = vmatprep.subr.mxu0 %v1017_v1 }
  0x43   : > { %727 = vmatpush3.msra.mxu0 %v316_v5 }
  0x44   : > { %728 = vmatprep.subr.mxu0 %v1017_v1 }
  0x45   : > { %729 = vmatpush3.msra.mxu0 %v315_v6 }
  0x46   : > { %730 = vmatprep.subr.mxu0 %v1017_v1 }
  0x47   : > { %731 = vmatpush3.msra.mxu0 %v314_v7 }
  0x48   : > { %732 = vmatprep.subr.mxu0 %v1017_v1 }
  0x49   : > { %733 = vmatpush3.msra.mxu0 %v313_v8 }
  0x4a   : > { %734 = vmatprep.subr.mxu0 %v1017_v1 }
  0x4b   : > { %735 = vmatpush3.msra.mxu0 %v312_v9 }
  0x4c   : > { %736 = vmatprep.subr.mxu0 %v1017_v1 }
  0x4d   : > { %737 = vmatpush3.msra.mxu0 %v311_v10 }
  0x4e   : > { %738 = vmatprep.subr.mxu0 %v1017_v1 }
  0x4f   : > { %739 = vmatpush3.msra.mxu0 %v310_v11 }
  0x50   : > { %740 = vmatprep.subr.mxu0 %v1017_v1 }
  0x51   : > { %741 = vmatpush3.msra.mxu0 %v309_v12 }
  0x52   : > { %742 = vmatprep.subr.mxu0 %v1017_v1 }
  0x53   : > { %743 = vmatpush3.msra.mxu0 %v308_v13 }
  0x54   : > { %744 = vmatprep.subr.mxu0 %v1017_v1 }
  0x55   : > { %745 = vmatpush3.msra.mxu0 %v307_v14 }
  0x56   : > { %746 = vmatprep.subr.mxu0 %v1017_v1 }
  0x57   : > { %747 = vmatpush3.msra.mxu0 %v306_v15 }
  0x58   : > { %748 = vmatprep.subr.mxu0 %v1017_v1 }
  0x59   : > { %749 = vmatpush3.msra.mxu0 %v305_v16 }
  0x5a   : > { %750 = vmatprep.subr.mxu0 %v1017_v1 }
  0x5b   : > { %751 = vmatpush3.msra.mxu0 %v304_v17 }
  0x5c   : > { %753 = vmatmul.mubr.f32.vlgmr.msra.gmra.mxu0 %v303_v18 }
 0x11c   : > { %v393_v20 = vpop.f32.mrf.mxu0 }
 0x11d   : > { %v394_v21 = vadd.f32 %v677_v19, %v393_v20 }
 0x11e   : > { %v754_v22 = vpop.f32.mrf.mxu0 }
 0x11f   : > { %v397_v23 = vmax.f32 %v394_v21, 0.0 }
 0x121   : > { %398 = vst [vmem:[#allocation2] sm:$0xff] %v397_v23 }
 0x122 PF: > { %v418_v24 = vld [vmem:[#allocation10 + $0x78] sm:$0xff]  ;;  %v1020_v25 = vmov 0.0   ;;  %v417_v26 = vld [vmem:[#allocation10 + $0x70] sm:$0xff]  ;;  %vm1021_vm2 = vmmov 0   ;;  %v416_v27 = vld [vmem:[#allocation10 + $0x68] sm:$0xff]  ;;  %p679_p3 = scmp.ne.s32.totalorder %s1002_s18, 0 }
 0x123   : > { %755 = vmatprep.subr.mxu0 %v1020_v25  ;;  %787 = vmatprep.mubr.msk.f32.mxu0 %vm1021_vm2, %v1020_v25  ;;  %v415_v28 = vld [vmem:[#allocation10 + $0x60] sm:$0xff]  ;;  %v414_v29 = vld [vmem:[#allocation10 + $0x58] sm:$0xff]  ;;  %v413_v30 = vld [vmem:[#allocation10 + $0x50] sm:$0xff] }
 0x124   : > { %756 = vmatpush3.msra.mxu0 %v418_v24  ;;  %v412_v31 = vld [vmem:[#allocation10 + $0x48] sm:$0xff]  ;;  %v411_v32 = vld [vmem:[#allocation10 + $0x40] sm:$0xff]  ;;  %v410_v33 = vld [vmem:[#allocation10 + $0x38] sm:$0xff] }
 0x125   : > { %757 = vmatprep.subr.mxu0 %v1020_v25  ;;  %v409_v34 = vld [vmem:[#allocation10 + $0x30] sm:$0xff]  ;;  %v408_v35 = vld [vmem:[#allocation10 + $0x28] sm:$0xff]  ;;  %v407_v36 = vld [vmem:[#allocation10 + $0x20] sm:$0xff] }
 0x126   : > { %758 = vmatpush3.msra.mxu0 %v417_v26  ;;  %v406_v37 = vld [vmem:[#allocation10 + $0x18] sm:$0xff]  ;;  %v405_v38 = vld [vmem:[#allocation10 + $0x10] sm:$0xff]  ;;  %v404_v39 = vld [vmem:[#allocation10 + $0x8] sm:$0xff] }
 0x127   : > { %759 = vmatprep.subr.mxu0 %v1020_v25  ;;  %v403_v40 = vld [vmem:[#allocation10] sm:$0xff] }
 0x128   : > { %760 = vmatpush3.msra.mxu0 %v416_v27  ;;  %v402_v41 = vld [vmem:[#allocation2] sm:$0xff] }
 0x129   : > { %761 = vmatprep.subr.mxu0 %v1020_v25  ;;  %v678_v42 = vld [vmem:[%s1187_s4] ss:$0 sm:$0xff] }
 0x12a   : > { %762 = vmatpush3.msra.mxu0 %v415_v28 }
 0x12b   : > { %763 = vmatprep.subr.mxu0 %v1020_v25 }
 0x12c   : > { %764 = vmatpush3.msra.mxu0 %v414_v29 }
 0x12d   : > { %765 = vmatprep.subr.mxu0 %v1020_v25 }
 0x12e   : > { %766 = vmatpush3.msra.mxu0 %v413_v30 }
 0x12f   : > { %767 = vmatprep.subr.mxu0 %v1020_v25 }
 0x130   : > { %768 = vmatpush3.msra.mxu0 %v412_v31 }
 0x131   : > { %769 = vmatprep.subr.mxu0 %v1020_v25 }
 0x132   : > { %770 = vmatpush3.msra.mxu0 %v411_v32 }
 0x133   : > { %771 = vmatprep.subr.mxu0 %v1020_v25 }
 0x134   : > { %772 = vmatpush3.msra.mxu0 %v410_v33 }
 0x135   : > { %773 = vmatprep.subr.mxu0 %v1020_v25 }
 0x136   : > { %774 = vmatpush3.msra.mxu0 %v409_v34 }
 0x137   : > { %775 = vmatprep.subr.mxu0 %v1020_v25 }
 0x138   : > { %776 = vmatpush3.msra.mxu0 %v408_v35 }
 0x139   : > { %777 = vmatprep.subr.mxu0 %v1020_v25 }
 0x13a   : > { %778 = vmatpush3.msra.mxu0 %v407_v36 }
 0x13b   : > { %779 = vmatprep.subr.mxu0 %v1020_v25 }
 0x13c   : > { %780 = vmatpush3.msra.mxu0 %v406_v37 }
 0x13d   : > { %781 = vmatprep.subr.mxu0 %v1020_v25 }
 0x13e   : > { %782 = vmatpush3.msra.mxu0 %v405_v38 }
 0x13f   : > { %783 = vmatprep.subr.mxu0 %v1020_v25 }
 0x140   : > { %784 = vmatpush3.msra.mxu0 %v404_v39 }
 0x141   : > { %785 = vmatprep.subr.mxu0 %v1020_v25 }
 0x142   : > { %786 = vmatpush3.msra.mxu0 %v403_v40 }
 0x143   : > { %788 = vmatmul.mubr.f32.vlgmr.msra.gmra.mxu0 %v402_v41 }
 0x201   : > { %498 = sbr.rel (%p679_p3) target bundleno = 941 (0x3ad), region = 60 }
 0x203   : > { %v492_v43 = vpop.f32.mrf.mxu0 }
 0x204   : > { %v493_v44 = vadd.f32 %v678_v42, %v492_v43 }
 0x205   : > { %v789_v45 = vpop.f32.mrf.mxu0 }
 0x206   : > { %500 = vmax.xlane.f32.xlu0 %v493_v44  ;;  %v1022_v46 = vmov 0   ;;  %v499_v47 = vld [vmem:[#allocation3] sm:$0xff]  ;;  %vm519_vm3 = vcmask 7168   ;;  %v503_v57 = vld [vmem:[#allocation4] sm:$0xff] }
 0x207   : > { %866 = vset.pattern.permute.xlu0 %v1022_v46 }
 0x28f   : > { %v501_v48 = vpop.xlane.xlu0 %500 }
 0x290   : > { %v502_v49 = vmax.f32 %v499_v47, %v501_v48 }
 0x292   : > { %v504_v50 = vsub.f32 %v499_v47, %v502_v49  ;;  %521 = vst.msk [vmem:[#allocation3] sm:$0xff] %vm519_vm3, %v502_v49  ;;  %510 = vperm.xlu0 %866, %v502_v49  }
 0x294   : > { %v505_v55 = vmul.f32 1.442695, %v504_v50 }
 0x30d   : > { %v511_v51 = vpop.permute.xlu0 %510 }
 0x30e   : > { %v513_v52 = vsub.f32 %v493_v44, %v511_v51 }
 0x310   : > { %v514_v53 = vmul.f32 1.442695, %v513_v52 }
 0x312   : > { %867 = vpow2.f32 %v514_v53 }
 0x313   : > { %869 = vpow2.f32 %v505_v55 }
 0x31f   : > { %v868_v54 = vpop.eup %867 }
 0x320   : > { %516 = vadd.xlane.f32.xlu1 %v868_v54  ;;  %v870_v56 = vpop.eup %869 }
 0x321   : > { %v507_v58 = vmul.f32 %v870_v56, %v503_v57 }
 0x3a9   : > { %v517_v59 = vpop.xlane.xlu1 %516 }
 0x3aa   : > { %v518_v60 = vadd.f32 %v517_v59, %v507_v58 }
 0x3ac   : > { %520 = vst.msk [vmem:[#allocation4] sm:$0xff] %vm519_vm3, %v518_v60 }
 0x3ad PF: > { %523 = sbr.rel (!%p297_p2) target bundleno = 967 (0x3c7), region = 64  ;;  %v524_v63 = vld [vmem:[#allocation3] sm:$0xff] (%p297_p2)  ;;  %vm529_vm4 = vcmask (%p297_p2), 7168  }
 0x3b3   : > { %v525_v61 = vld [vmem:[#allocation4] sm:$0xff] }
 0x3b4   : > { %871 = vlog2.f32 %v525_v61 }
 0x3c1   : > { %v872_v62 = vpop.eup %871 }
 0x3c2   : > { %v527_v0 = vmul.f32 0.6931472, %v872_v62 }
 0x3c4   : > { %v528_v1 = vadd.f32 %v527_v0, %v524_v63 }
 0x3c6   : > { %530 = vst.msk [vmem:[#allocation3] sm:$0xff] %vm529_vm4, %v528_v1 }
 0x3c7 PF: > { %p680_p5 = scmp.ne.s32.totalorder %s1002_s18, 1 }
 0x3c9   : > { %534 = sbr.rel (%p680_p5) target bundleno = 1103 (0x44f), region = 68 }
 0x3ce   : > { %v535_v2 = vld [vmem:[#allocation3] sm:$0xff]  ;;  %v1023_v3 = vmov 0  }
 0x3cf   : > { %873 = vset.pattern.permute.xlu0 %v1023_v3 }
 0x3d0   : > { %538 = vperm.xlu0 %873, %v535_v2  }
 0x44b   : > { %v539_v4 = vpop.permute.xlu0 %538 }
 0x44c   : > { %v541_v5 = vsub.f32 %v493_v44, %v539_v4 }
 0x44e   : > { %542 = vst [vmem:[#allocation11] sm:$0xff] %v541_v5 }
 0x44f PF: > { %p1160_p8 = scmp.eq.s32.totalorder %s665_s23, 1  ;;  %s1024_s6 = smov [#allocation11]  }
 0x450   : > { %s559_s7 = sshll.u32 %s1024_s6, 4  ;;  %s560_s7 = int_to_ptr.vmem [resolvable:$true] %s559_s7 }
 0x451   : > { %s952_s18 = scalar_lea.vmem %s560_s7, 128  ;;  %s958_s8 = scalar_lea.vmem %s560_s7, 256 }
 0x452   : > { %p953_p10 = scmp.ne.s32.totalorder %s560_s7, %s952_s18  ;;  %p959_p6 = scmp.lt.s32.totalorder %s560_s7, %s560_s7 }
 0x453   : > { %p960_p13 = scmp.lt.s32.totalorder %s958_s8, %s952_s18 }
 0x454   : > { %p954_p11 = pnand %p953_p10, %p1160_p8 }
 0x455   : > { %p961_p0 = por %p960_p13, %p959_p6 }
 0x456   : > { %p955_p12 = pneg %p954_p11 }
 0x458   : > { %p962_p1 = pnand %p961_p0, %p955_p12 }
 0x45a   : > { %965 = shalt.err (!%p962_p1)
}
 0x45b   : > { %803 = dma.vmem_to_hbm [thread:$0]  (%p1160_p8), %s560_s7, 128, %s1188_s5, [#allocation7]  }
 0x45c PF: > { %p827_p4 = scmp.ge.s32.totalorder %s1010_s20, 2  ;;  %p828_p9 = scmp.eq.s32.totalorder %s666_s24, 1 }
 0x45e   : > { %p817_p7 = pnand %p828_p9, %p827_p4 }
 0x460   : > { %p818_p2 = pneg %p817_p7 }
 0x462   : > { %997 = dma.done.wait (%p818_p2), [#allocation7], 128  }
 0x463   : > { %999 = vsyncadd (%p818_p2), [#allocation7], 4294967168  ;;  %s20_s20 = sadd.s32 1, %s1010_s20   ;;  %s1197_s18 = smov %s1006_s19 }
 0x464   : > { %p17_p3 = scmp.ge.s32.totalorder %s20_s20, 4   ;;  %s1198_s19 = smov %s1200_s28 }
 0x466   :  { %19 = sbr.rel (!%p17_p3) target bundleno = 5 (0x5), region = 106 }
 0x46b   :  { %577 = vsyncpa [#allocation6], 1 }
 0x46c   :  { %579 = vsyncpa [#allocation6 + $0x1], 1 }
 0x46d   :  { %580 = vsyncpa [#allocation9], 1 }
 0x46e   :  { %581 = vsyncpa [#allocation7], 1 }
 0x46f   :  { %583 = vsyncpa [#allocation7 + $0x1], 1 }

</bundles_post_ra>
